<compile_context>
chip_gen: v5e
topology: v5e:2x2
jax: 0.10.0
libtpu: 0.0.40
codegen_flags: <defaults>
</compile_context>

<pallas_src>
import jax
import jax.numpy as jnp
from jax import lax
from jax.experimental import pallas as pl
from jax.experimental.pallas import tpu as pltpu


def _classifier_kernel(x_ref, w_ref, b_ref, o_ref):
    # x: (TB, H)   w: (C, H)   b: (1, C)   o: (TB, C)
    x = x_ref[...].astype(jnp.float32)
    w = w_ref[...].astype(jnp.float32)
    b = b_ref[...].astype(jnp.float32)

    h = jnp.tanh(x)  # EUP transcendental, f32

    # Contract the hidden axis of both operands (no materialized transpose).
    y = lax.dot_general(
        h, w,
        dimension_numbers=(((1,), (1,)), ((), ())),
        preferred_element_type=jnp.float32,
    )  # (TB, C), f32 accumulation on the MXU

    o_ref[...] = (y + b).astype(o_ref.dtype)


def classifier_forward(feature, weight, bias, *, block_b=128):
    """Pallas equivalent of Classifier.forward: Linear(tanh(feature)).

    feature: (B, H)   weight: (C, H)   bias: (C,)   ->  (B, C)
    """
    B, H = feature.shape
    C, H_w = weight.shape
    assert H == H_w, (feature.shape, weight.shape)
    assert bias.shape == (C,), bias.shape

    tb = B if B <= block_b else block_b
    grid = (pl.cdiv(B, tb),)
    bias_2d = bias.reshape(1, C)

    out = pl.pallas_call(
        _classifier_kernel,
        out_shape=jax.ShapeDtypeStruct((B, C), feature.dtype),
        grid_spec=pltpu.PrefetchScalarGridSpec(
            num_scalar_prefetch=0,
            grid=grid,
            in_specs=[
                pl.BlockSpec((tb, H), lambda i: (i, 0)),   # batch tile of activations
                pl.BlockSpec((C, H), lambda i: (0, 0)),    # weight, VMEM-resident
                pl.BlockSpec((1, C), lambda i: (0, 0)),    # bias, VMEM-resident
            ],
            out_specs=pl.BlockSpec((tb, C), lambda i: (i, 0)),
        ),
        compiler_params=pltpu.CompilerParams(
            dimension_semantics=("parallel",),  # batch tiles are independent
        ),
    )(feature, weight, bias_2d)
    return out


if __name__ == "__main__":
    key = jax.random.PRNGKey(0)
    k_feat, k_w = jax.random.split(key)

    # Small shapes consistent with the module: batch=8, hidden=32, num_class=4.
    B, H, C = 8, 32, 4
    feature = jax.random.normal(k_feat, (B, H), dtype=jnp.float32)
    # Match Classifier.init_weights(): weight ~ U(-0.02, 0.02), bias = 0.
    weight = jax.random.uniform(k_w, (C, H), dtype=jnp.float32,
                                minval=-0.02, maxval=0.02)
    bias = jnp.zeros((C,), dtype=jnp.float32)

    out = classifier_forward(feature, weight, bias)
    out = jax.block_until_ready(out)

    # Pure-JAX reference (same math as the PyTorch module, dropout unused).
    ref = jnp.tanh(feature) @ weight.T + bias
    assert out.shape == (B, C), out.shape
    assert jnp.allclose(out, ref, atol=1e-5, rtol=1e-5), (out, ref)

    # TODO(synk): nn.Dropout(hidden_dropout_prob) is declared but never applied
    # in the reference forward, so no dropout kernel is emitted.
    print("KERNEL_OK")
</pallas_src>

<mosaic_0001>
module attributes {stable_mosaic.version = 11 : i64} {
  func.func @_classifier_kernel(%arg0: i32, %arg1: memref<8x32xf32, #tpu.memory_space<vmem>>, %arg2: memref<4x32xf32, #tpu.memory_space<vmem>>, %arg3: memref<1x4xf32, #tpu.memory_space<vmem>>, %arg4: memref<8x4xf32, #tpu.memory_space<vmem>>) attributes {dimension_semantics = [#tpu.dimension_semantics<parallel>], iteration_bounds = array<i64: 1>, scalar_prefetch = 0 : i64, scratch_operands = 0 : i64, tpu.core_type = #tpu.core_type<tc>, window_params = [{transform_indices = @transform_0, window_bounds = array<i64: 8, 32>}, {pipeline_mode = #tpu.pipeline_mode<synchronous>, transform_indices = @transform_1, window_bounds = array<i64: 4, 32>}, {pipeline_mode = #tpu.pipeline_mode<synchronous>, transform_indices = @transform_2, window_bounds = array<i64: 1, 4>}, {transform_indices = @transform_3, window_bounds = array<i64: 8, 4>}]} {
    %c0 = arith.constant 0 : index
    %c0_0 = arith.constant 0 : index
    %0 = vector.load %arg1[%c0, %c0_0] : memref<8x32xf32, #tpu.memory_space<vmem>>, vector<8x32xf32>
    %c0_1 = arith.constant 0 : index
    %c0_2 = arith.constant 0 : index
    %1 = vector.load %arg2[%c0_1, %c0_2] : memref<4x32xf32, #tpu.memory_space<vmem>>, vector<4x32xf32>
    %c0_3 = arith.constant 0 : index
    %c0_4 = arith.constant 0 : index
    %2 = vector.load %arg3[%c0_3, %c0_4] : memref<1x4xf32, #tpu.memory_space<vmem>>, vector<1x4xf32>
    %3 = math.tanh %0 : vector<8x32xf32>
    %cst = arith.constant dense<0.000000e+00> : vector<8x4xf32>
    %4 = tpu.matmul %3, %1, %cst {dimension_numbers = #tpu.dot_dimension_numbers<[1], [1], [0], [0], [0, 0, 1, 0], [], []>} : vector<8x32xf32>, vector<4x32xf32>, vector<8x4xf32> -> vector<8x4xf32>
    %5 = vector.broadcast %2 : vector<1x4xf32> to vector<8x4xf32>
    %6 = arith.addf %4, %5 : vector<8x4xf32>
    %c0_5 = arith.constant 0 : index
    %c0_6 = arith.constant 0 : index
    %7 = vector.load %arg4[%c0_5, %c0_6] : memref<8x4xf32, #tpu.memory_space<vmem>>, vector<8x4xf32>
    tpu.vector_store %arg4[%c0_5, %c0_6], %6 {strides = array<i32>} : memref<8x4xf32, #tpu.memory_space<vmem>>, vector<8x4xf32>,
    return
  }
  func.func @transform_0(%arg0: i32) -> (i32, i32) {
    %c0_i32 = arith.constant 0 : i32
    %c0_i32_0 = arith.constant 0 : i32
    return %arg0, %c0_i32 : i32, i32
  }
  func.func @transform_1(%arg0: i32) -> (i32, i32) {
    %c0_i32 = arith.constant 0 : i32
    %c0_i32_0 = arith.constant 0 : i32
    %c0_i32_1 = arith.constant 0 : i32
    return %c0_i32, %c0_i32_0 : i32, i32
  }
  func.func @transform_2(%arg0: i32) -> (i32, i32) {
    %c0_i32 = arith.constant 0 : i32
    %c0_i32_0 = arith.constant 0 : i32
    %c0_i32_1 = arith.constant 0 : i32
    return %c0_i32, %c0_i32_0 : i32, i32
  }
  func.func @transform_3(%arg0: i32) -> (i32, i32) {
    %c0_i32 = arith.constant 0 : i32
    %c0_i32_0 = arith.constant 0 : i32
    return %arg0, %c0_i32 : i32, i32
  }
}

</mosaic_0001>

<bundles_post_ra>
// kernel: tpu_custom_call.1
= control target key start
LH: loop header
LB: loop body
LE: loop exit
PB: predicated region body
PF: predicated region fallthrough
CT: control target
= control target key end

     0   :  { %8 = vsyncpa [#allocation3], 0  ;;  %s177_s0 = inlined_call_operand.hbm [shape: f32[8,32], index: 0, kind: input, shape index: {}]   ;;  %s178_s1 = inlined_call_operand.hbm [shape: f32[4,32], index: 1, kind: input, shape index: {}]   ;;  %s179_s2 = inlined_call_operand.vmem [shape: f32[1,4], index: 2, kind: input, shape index: {}]   ;;  %s180_s3 = inlined_call_operand.vmem [shape: f32[8,4], index: 3, kind: output, shape index: {}]  }
   0x1   :  { %s15_s14 = sshll.u32 %s177_s0, 4  ;;  %s16_s14 = int_to_ptr.hbm [resolvable:$true] %s15_s14 }
   0x2   :  { %9 = vsyncpa [#allocation5], 0  ;;  %s143_s15 = smov [#allocation2]   ;;  %s26_s19 = sshll.u32 %s178_s1, 4  ;;  %s27_s19 = int_to_ptr.hbm [resolvable:$true] %s26_s19 }
   0x3   :  { %s17_s16 = sshll.u32 %s143_s15, 4  ;;  %s144_s20 = smov [#allocation4]   ;;  %s18_s16 = int_to_ptr.vmem [resolvable:$true] %s17_s16 }
   0x4   :  { %20 = dma.hbm_to_vmem [thread:$0]  %s16_s14, 128, %s18_s16, [#allocation3]  }
   0x5   :  { %s28_s21 = sshll.u32 %s144_s20, 4  ;;  %s29_s21 = int_to_ptr.vmem [resolvable:$true] %s28_s21 }
   0x6   :  { %31 = dma.hbm_to_vmem [thread:$0]  %s27_s19, 64, %s29_s21, [#allocation5]  }
   0x7   :  { %139 = dma.done.wait [#allocation3], 128  }
   0x8   :  { %140 = vsyncadd [#allocation3], 4294967168 }
   0x9   :  { %141 = dma.done.wait [#allocation5], 64  }
   0xa   :  { %142 = vsyncadd [#allocation5], 4294967232  ;;  %vm49_vm0 = vcmask 261120   ;;  %v43_v0 = vld [vmem:[#allocation4] sm:$0xf]  ;;  %v42_v1 = vld [vmem:[#allocation2] sm:$0xff] }
   0xb   :  { %84 = vmatpush.xpose.msk.msra.mxu0 %vm49_vm0, %v43_v0  ;;  %89 = vtanh.f32 %v42_v1  ;;  %v88_v3 = vld [vmem:[%s179_s2] ss:$0 sm:$0xff]  ;;  %vm76_vm1 = vcmask 31744  }
  0x11   :  { %v90_v2 = vpop.eup %89 }
  0x12   :  { %85 = vmatmul.msk.f32.vlgmr.msra.gmra.mxu0 %vm49_vm0, %v90_v2 }
  0x8f   :  { %v73_v4 = vpop.f32.mrf.mxu0 }
  0x90   :  { %v74_v5 = vadd.f32 %v88_v3, %v73_v4 }
  0x92   :  { %77 = vst.msk [vmem:[%s180_s3] sm:$0xff] %vm76_vm1, %v74_v5 }
  0x93   :  { %82 = vsyncpa [#allocation3], 1 }
  0x94   :  { %83 = vsyncpa [#allocation5], 1 }

</bundles_post_ra>
